<compile_context>
chip_gen: v7x
topology: tpu7x:2x2x1
jax: 0.10.0
libtpu: 0.0.40
codegen_flags: <defaults>
</compile_context>

<pallas_src>
import jax
import jax.numpy as jnp
from jax import lax
from jax.experimental import pallas as pl
from jax.experimental.pallas import tpu as pltpu

# ---------------- hyper-parameters (mirror KGAT_rotatE.__init__ / args) ----------------
N_USERS       = 8
N_ENTITIES    = 24
N_RELATIONS   = 4
ENTITY_DIM    = 16                       # args.entity_dim
RELATION_DIM  = 16                       # args.relation_dim (== entity_dim for RotatE)
CONV_DIMS     = [ENTITY_DIM * 2, 16, 8]  # [entity_dim*2] + eval(args.conv_dim_list)
N_LAYERS      = len(CONV_DIMS) - 1
ALL_DIM       = sum(CONV_DIMS)           # width of the implicit concat (32+16+8 = 56)
GAMMA         = 12.0                     # args.gamma
EPSILON       = 2.0
ADV_TEMP      = 1.0                      # args.adversarial_temperature (unused: 1 negative)
PI            = 3.1415926235897933       # kept exactly as written in the PyTorch module (self.pi)
ENT_RANGE     = (GAMMA + EPSILON) / ENTITY_DIM * 2
REL_RANGE     = (GAMMA + EPSILON) / RELATION_DIM
LEAKY_SLOPE   = 0.01                     # nn.LeakyReLU default

N_NODES       = N_ENTITIES + N_USERS
KG_BATCH      = 8
N_EVAL_USERS  = 8
N_EVAL_ITEMS  = 16

_VMEM_SPEC = pl.BlockSpec(memory_space=pltpu.MemorySpace.VMEM)
_SMEM_SPEC = pl.BlockSpec(memory_space=pltpu.MemorySpace.SMEM)


# ------------------------------------ helpers ------------------------------------------
def _log_sigmoid(x):
    # numerically stable log(sigmoid(x)) = -softplus(-x)
    return -(jnp.maximum(-x, 0.0) + jnp.log1p(jnp.exp(-jnp.abs(x))))


def _leaky_relu(x):
    return jnp.where(x > 0, x, LEAKY_SLOPE * x)


# ---------------------------------- Pallas kernels --------------------------------------
def _make_predict_kernel(n_u):
    """Fused cf_score: L aggregator layers + concat + user/item gather + u @ i.T."""

    def kernel(*refs):
        node_ref, att_ref = refs[0], refs[1]
        layer_refs = refs[2:2 + 4 * N_LAYERS]
        ui_ref = refs[2 + 4 * N_LAYERS]          # stacked [user_ids; item_ids], (n_u+n_i, 1)
        score_ref = refs[3 + 4 * N_LAYERS]
        allemb_ref = refs[4 + 4 * N_LAYERS]      # (N_NODES, ALL_DIM) VMEM scratch

        ego = node_ref[...]
        # bf16 operands for the message-passing matmul: one MXU pass instead of the
        # multi-pass f32xf32 emulation; accumulation stays f32.
        att_bf = att_ref[...].astype(jnp.bfloat16)

        # Implicit concat([ego, norm_1, ..., norm_L], dim=1): each segment is written once
        # into the VMEM scratch at its static lane offset, so the score path below needs
        # only ONE gather matmul and ONE score matmul (instead of 9 tiny MXU ops).
        allemb_ref[:, 0:CONV_DIMS[0]] = ego
        off = CONV_DIMS[0]
        for k in range(N_LAYERS):
            w1, b1, w2, b2 = (r[...] for r in layer_refs[4 * k:4 * k + 4])
            # message passing (u_mul_e + sum over incoming edges) == dense matmul
            n_h = jnp.dot(att_bf, ego.astype(jnp.bfloat16),
                          preferred_element_type=jnp.float32)
            s = ego + n_h
            p = ego * n_h
            out = (_leaky_relu(jnp.dot(s, w1, preferred_element_type=jnp.float32) + b1)
                   + _leaky_relu(jnp.dot(p, w2, preferred_element_type=jnp.float32) + b2))
            # TODO(synk): message_dropout is identity (eval mode); training dropout not modeled.
            # F.normalize(out, p=2, dim=1) via rsqrt + multiply (EUP path, no divide).
            inv_nrm = lax.rsqrt(jnp.sum(out * out, axis=1, keepdims=True) + 1e-24)
            allemb_ref[:, off:off + CONV_DIMS[k + 1]] = out * inv_nrm
            off += CONV_DIMS[k + 1]
            ego = out

        # Stacked user+item one-hot selector -> ONE gather matmul over the full concat,
        # split by sublane rows (cheap), then ONE dot_general contracting the last axes
        # (no in-kernel transpose).
        # TODO(synk): at real KGAT scale replace the one-hot matmul gather with
        #             scalar-prefetched / DMA row gathers (O(B*dim) instead of O(B*N))
        #             and tile `att` over node-row blocks (mandatory for v7x 64 MiB VMEM).
        n_ui = ui_ref.shape[0]
        sel = (lax.broadcasted_iota(jnp.int32, (n_ui, N_NODES), 1)
               == ui_ref[...]).astype(jnp.float32)
        ui = jnp.dot(sel, allemb_ref[...], preferred_element_type=jnp.float32)
        u = ui[:n_u, :]
        it = ui[n_u:, :]
        score_ref[...] = lax.dot_general(
            u, it, dimension_numbers=(((1,), (1,)), ((), ())),
            preferred_element_type=jnp.float32)

    return kernel


def _make_kg_loss_kernel(batch):
    """RotatE KG loss; h/pos_t/neg_t embedding gathers fused into ONE one-hot MXU matmul."""

    def kernel(ent_ref, rel_ref, hpn_ref, r_ref, loss_ref):
        ent = ent_ref[...]
        rel = rel_ref[...]

        # Single stacked gather for [h; pos_t; neg_t]  ->  (3B, 2D), then row-block slices.
        node_iota = lax.broadcasted_iota(jnp.int32, (3 * batch, N_NODES), 1)
        sel = (node_iota == hpn_ref[...]).astype(jnp.float32)
        hpn = jnp.dot(sel, ent, preferred_element_type=jnp.float32)
        h = hpn[:batch, :]
        pt = hpn[batch:2 * batch, :]
        nt = hpn[2 * batch:, :]

        rel_iota = lax.broadcasted_iota(jnp.int32, (batch, N_RELATIONS), 1)
        r_sel = (rel_iota == r_ref[...]).astype(jnp.float32)
        r = jnp.dot(r_sel, rel, preferred_element_type=jnp.float32)   # (B, D)

        D = ENTITY_DIM
        re_h, im_h = h[:, :D], h[:, D:]
        re_pt, im_pt = pt[:, :D], pt[:, D:]
        re_nt, im_nt = nt[:, :D], nt[:, D:]

        phase = r * (PI / REL_RANGE)           # r / (rel_embedding_range / pi)
        re_r = jnp.cos(phase)
        im_r = jnp.sin(phase)
        re_s = re_h * re_r - im_h * im_r
        im_s = re_h * im_r + im_h * re_r

        pos_re = re_s - re_pt
        pos_im = im_s - im_pt
        pos_score = jnp.sum(jnp.sqrt(pos_re * pos_re + pos_im * pos_im),
                            axis=-1, keepdims=True)                  # (B, 1)
        final_pos = GAMMA - pos_score

        neg_re = re_s - re_nt
        neg_im = im_s - im_nt
        neg_score = jnp.sum(jnp.sqrt(neg_re * neg_re + neg_im * neg_im),
                            axis=-1, keepdims=True)                  # (B, 1)
        final_neg = GAMMA - neg_score

        # F.softmax over a size-1 axis is identically 1.0 (single negative per sample),
        # so the adversarial weighting reduces to log_sigmoid(-final_neg).
        kg_loss = (-_log_sigmoid(final_pos) - _log_sigmoid(-final_neg)) * 0.5   # (B, 1)
        # scalar mean written straight to the SMEM output (no masked VMEM tile store)
        loss_ref[0, 0] = jnp.sum(kg_loss) * (1.0 / batch)

    return kernel


# ---------------------------------- wrappers --------------------------------------------
def forward_predict(params, att, user_ids, item_ids):
    """mode == 'predict': single fused pallas_call for the whole cf_score path."""
    flat_layers = [w for layer in params["layers"] for w in layer]
    n_u = int(user_ids.shape[0])
    n_i = int(item_ids.shape[0])
    ui = jnp.concatenate([user_ids, item_ids]).reshape(-1, 1).astype(jnp.int32)
    inputs = [params["entity_user_embed"], att] + flat_layers + [ui]
    out_shape = jax.ShapeDtypeStruct((n_u, n_i), jnp.float32)
    return pl.pallas_call(
        _make_predict_kernel(n_u),
        in_specs=[_VMEM_SPEC] * len(inputs),
        out_specs=_VMEM_SPEC,
        out_shape=out_shape,
        scratch_shapes=[pltpu.VMEM((N_NODES, ALL_DIM), jnp.float32)],
    )(*inputs)


def forward_calc_kg_loss(params, h, r, pos_t, neg_t):
    """mode == 'calc_kg_loss': single fused pallas_call (stacked in-kernel gathers)."""
    batch = int(h.shape[0])
    hpn = jnp.concatenate([h, pos_t, neg_t]).reshape(-1, 1).astype(jnp.int32)
    rid = r.reshape(-1, 1).astype(jnp.int32)
    inputs = [params["entity_user_embed"], params["relation_embed"], hpn, rid]
    loss = pl.pallas_call(
        _make_kg_loss_kernel(batch),
        in_specs=[_VMEM_SPEC] * len(inputs),
        out_specs=_SMEM_SPEC,
        out_shape=jax.ShapeDtypeStruct((1, 1), jnp.float32),
    )(*inputs)
    return loss[0, 0]


# ------------------------------ model (parameters) --------------------------------------
def init_params(key):
    ks = jax.random.split(key, 2 + 4 * N_LAYERS)
    params = {}
    params["entity_user_embed"] = jax.random.uniform(
        ks[0], (N_NODES, ENTITY_DIM * 2), jnp.float32, -ENT_RANGE, ENT_RANGE)
    params["relation_embed"] = jax.random.uniform(
        ks[1], (N_RELATIONS, RELATION_DIM), jnp.float32, -REL_RANGE, REL_RANGE)
    layers = []
    for k in range(N_LAYERS):
        din, dout = CONV_DIMS[k], CONV_DIMS[k + 1]
        scale = 1.0 / jnp.sqrt(jnp.float32(din))
        w1 = jax.random.uniform(ks[2 + 4 * k + 0], (din, dout), jnp.float32, -scale, scale)
        b1 = jax.random.uniform(ks[2 + 4 * k + 1], (1, dout), jnp.float32, -scale, scale)
        w2 = jax.random.uniform(ks[2 + 4 * k + 2], (din, dout), jnp.float32, -scale, scale)
        b2 = jax.random.uniform(ks[2 + 4 * k + 3], (1, dout), jnp.float32, -scale, scale)
        layers.append((w1, b1, w2, b2))
    params["layers"] = layers
    return params


# ------------------------------------ main ----------------------------------------------
if __name__ == "__main__":
    key = jax.random.PRNGKey(0)
    k_param, k_att, k_h, k_r, k_pt, k_nt = jax.random.split(key, 6)

    params = init_params(k_param)

    # Dense, row-softmaxed attention matrix standing in for DGL's edge_softmax output.
    # TODO(synk): DGL graph construction / filter_edges / edge_softmax ('calc_att' mode)
    #             has no Pallas equivalent; a dense normalized attention matrix is used.
    att_logits = jax.random.normal(k_att, (N_NODES, N_NODES), jnp.float32)
    att = jax.nn.softmax(att_logits, axis=1)

    # 'predict' mode
    user_ids = N_ENTITIES + jnp.arange(N_EVAL_USERS, dtype=jnp.int32)
    item_ids = jnp.arange(N_EVAL_ITEMS, dtype=jnp.int32)
    scores = forward_predict(params, att, user_ids, item_ids)
    scores = jax.block_until_ready(scores)
    assert scores.shape == (N_EVAL_USERS, N_EVAL_ITEMS)
    assert bool(jnp.all(jnp.isfinite(scores)))

    # 'calc_kg_loss' mode
    h = jax.random.randint(k_h, (KG_BATCH,), 0, N_ENTITIES)
    r = jax.random.randint(k_r, (KG_BATCH,), 0, N_RELATIONS)
    pos_t = jax.random.randint(k_pt, (KG_BATCH,), 0, N_ENTITIES)
    neg_t = jax.random.randint(k_nt, (KG_BATCH,), 0, N_ENTITIES)
    loss = forward_calc_kg_loss(params, h, r, pos_t, neg_t)
    loss = jax.block_until_ready(loss)
    assert loss.shape == () and jnp.isfinite(loss)

    print("KERNEL_OK")
</pallas_src>

<mosaic_0001>
module attributes {stable_mosaic.version = 11 : i64} {
  func.func @kernel(%arg0: memref<32x32xf32, #tpu.memory_space<vmem>>, %arg1: memref<32x32xf32, #tpu.memory_space<vmem>>, %arg2: memref<32x16xf32, #tpu.memory_space<vmem>>, %arg3: memref<1x16xf32, #tpu.memory_space<vmem>>, %arg4: memref<32x16xf32, #tpu.memory_space<vmem>>, %arg5: memref<1x16xf32, #tpu.memory_space<vmem>>, %arg6: memref<16x8xf32, #tpu.memory_space<vmem>>, %arg7: memref<1x8xf32, #tpu.memory_space<vmem>>, %arg8: memref<16x8xf32, #tpu.memory_space<vmem>>, %arg9: memref<1x8xf32, #tpu.memory_space<vmem>>, %arg10: memref<24x1xi32, #tpu.memory_space<vmem>>, %arg11: memref<8x16xf32, #tpu.memory_space<vmem>>, %arg12: memref<32x56xf32, #tpu.memory_space<vmem>>) attributes {dimension_semantics = [], scalar_prefetch = 0 : i64, scratch_operands = 1 : i64, tpu.core_type = #tpu.core_type<tc>} {
    %c0 = arith.constant 0 : index
    %c0_0 = arith.constant 0 : index
    %0 = vector.load %arg0[%c0, %c0_0] : memref<32x32xf32, #tpu.memory_space<vmem>>, vector<32x32xf32>
    %c0_1 = arith.constant 0 : index
    %c0_2 = arith.constant 0 : index
    %1 = vector.load %arg1[%c0_1, %c0_2] : memref<32x32xf32, #tpu.memory_space<vmem>>, vector<32x32xf32>
    %2 = arith.truncf %1 : vector<32x32xf32> to vector<32x32xbf16>
    %c0_3 = arith.constant 0 : index
    %c0_4 = arith.constant 0 : index
    %3 = vector.load %arg12[%c0_3, %c0_4] : memref<32x56xf32, #tpu.memory_space<vmem>>, vector<32x32xf32>
    tpu.vector_store %arg12[%c0_3, %c0_4], %0 {strides = array<i32>} : memref<32x56xf32, #tpu.memory_space<vmem>>, vector<32x32xf32>,
    %c0_5 = arith.constant 0 : index
    %c0_6 = arith.constant 0 : index
    %4 = vector.load %arg2[%c0_5, %c0_6] : memref<32x16xf32, #tpu.memory_space<vmem>>, vector<32x16xf32>
    %c0_7 = arith.constant 0 : index
    %c0_8 = arith.constant 0 : index
    %5 = vector.load %arg3[%c0_7, %c0_8] : memref<1x16xf32, #tpu.memory_space<vmem>>, vector<1x16xf32>
    %c0_9 = arith.constant 0 : index
    %c0_10 = arith.constant 0 : index
    %6 = vector.load %arg4[%c0_9, %c0_10] : memref<32x16xf32, #tpu.memory_space<vmem>>, vector<32x16xf32>
    %c0_11 = arith.constant 0 : index
    %c0_12 = arith.constant 0 : index
    %7 = vector.load %arg5[%c0_11, %c0_12] : memref<1x16xf32, #tpu.memory_space<vmem>>, vector<1x16xf32>
    %8 = arith.truncf %0 : vector<32x32xf32> to vector<32x32xbf16>
    %cst = arith.constant dense<0.000000e+00> : vector<32x32xf32>
    %9 = tpu.matmul %2, %8, %cst {dimension_numbers = #tpu.dot_dimension_numbers<[1], [0], [0], [1], [0, 0, 1, 1], [], []>} : vector<32x32xbf16>, vector<32x32xbf16>, vector<32x32xf32> -> vector<32x32xf32>
    %10 = arith.addf %0, %9 : vector<32x32xf32>
    %11 = arith.mulf %0, %9 : vector<32x32xf32>
    %cst_13 = arith.constant dense<0.000000e+00> : vector<32x16xf32>
    %12 = tpu.matmul %10, %4, %cst_13 {dimension_numbers = #tpu.dot_dimension_numbers<[1], [0], [0], [1], [0, 0, 1, 1], [], []>} : vector<32x32xf32>, vector<32x16xf32>, vector<32x16xf32> -> vector<32x16xf32>
    %13 = vector.broadcast %5 : vector<1x16xf32> to vector<32x16xf32>
    %14 = arith.addf %12, %13 : vector<32x16xf32>
    %cst_14 = arith.constant 0.000000e+00 : f32
    %15 = vector.broadcast %cst_14 : f32 to vector<32x16xf32>
    %16 = arith.cmpf ogt, %14, %15 : vector<32x16xf32>
    %cst_15 = arith.constant 0.00999999977 : f32
    %17 = vector.broadcast %cst_15 : f32 to vector<32x16xf32>
    %18 = arith.mulf %17, %14 : vector<32x16xf32>
    %19 = arith.select %16, %14, %18 : vector<32x16xi1>, vector<32x16xf32>
    %cst_16 = arith.constant dense<0.000000e+00> : vector<32x16xf32>
    %20 = tpu.matmul %11, %6, %cst_16 {dimension_numbers = #tpu.dot_dimension_numbers<[1], [0], [0], [1], [0, 0, 1, 1], [], []>} : vector<32x32xf32>, vector<32x16xf32>, vector<32x16xf32> -> vector<32x16xf32>
    %21 = vector.broadcast %7 : vector<1x16xf32> to vector<32x16xf32>
    %22 = arith.addf %20, %21 : vector<32x16xf32>
    %cst_17 = arith.constant 0.000000e+00 : f32
    %23 = vector.broadcast %cst_17 : f32 to vector<32x16xf32>
    %24 = arith.cmpf ogt, %22, %23 : vector<32x16xf32>
    %cst_18 = arith.constant 0.00999999977 : f32
    %25 = vector.broadcast %cst_18 : f32 to vector<32x16xf32>
    %26 = arith.mulf %25, %22 : vector<32x16xf32>
    %27 = arith.select %24, %22, %26 : vector<32x16xi1>, vector<32x16xf32>
    %28 = arith.addf %19, %27 : vector<32x16xf32>
    %29 = arith.mulf %28, %28 : vector<32x16xf32>
    %cst_19 = arith.constant dense<0.000000e+00> : vector<32xf32>
    %30 = vector.multi_reduction <add>, %29, %cst_19 [1] : vector<32x16xf32> to vector<32xf32>
    %31 = vector.shape_cast %30 : vector<32xf32> to vector<32x1xf32>
    %cst_20 = arith.constant 1.000000e-24 : f32
    %32 = vector.broadcast %cst_20 : f32 to vector<32x1xf32>
    %33 = arith.addf %31, %32 : vector<32x1xf32>
    %34 = math.rsqrt %33 : vector<32x1xf32>
    %35 = vector.broadcast %34 : vector<32x1xf32> to vector<32x16xf32>
    %36 = arith.mulf %28, %35 : vector<32x16xf32>
    %c0_21 = arith.constant 0 : index
    %c32 = arith.constant 32 : index
    %37 = vector.load %arg12[%c0_21, %c32] : memref<32x56xf32, #tpu.memory_space<vmem>>, vector<32x16xf32>
    tpu.vector_store %arg12[%c0_21, %c32], %36 {strides = array<i32>} : memref<32x56xf32, #tpu.memory_space<vmem>>, vector<32x16xf32>,
    %c0_22 = arith.constant 0 : index
    %c0_23 = arith.constant 0 : index
    %38 = vector.load %arg6[%c0_22, %c0_23] : memref<16x8xf32, #tpu.memory_space<vmem>>, vector<16x8xf32>
    %c0_24 = arith.constant 0 : index
    %c0_25 = arith.constant 0 : index
    %39 = vector.load %arg7[%c0_24, %c0_25] : memref<1x8xf32, #tpu.memory_space<vmem>>, vector<1x8xf32>
    %c0_26 = arith.constant 0 : index
    %c0_27 = arith.constant 0 : index
    %40 = vector.load %arg8[%c0_26, %c0_27] : memref<16x8xf32, #tpu.memory_space<vmem>>, vector<16x8xf32>
    %c0_28 = arith.constant 0 : index
    %c0_29 = arith.constant 0 : index
    %41 = vector.load %arg9[%c0_28, %c0_29] : memref<1x8xf32, #tpu.memory_space<vmem>>, vector<1x8xf32>
    %42 = arith.truncf %28 : vector<32x16xf32> to vector<32x16xbf16>
    %cst_30 = arith.constant dense<0.000000e+00> : vector<32x16xf32>
    %43 = tpu.matmul %2, %42, %cst_30 {dimension_numbers = #tpu.dot_dimension_numbers<[1], [0], [0], [1], [0, 0, 1, 1], [], []>} : vector<32x32xbf16>, vector<32x16xbf16>, vector<32x16xf32> -> vector<32x16xf32>
    %44 = arith.addf %28, %43 : vector<32x16xf32>
    %45 = arith.mulf %28, %43 : vector<32x16xf32>
    %cst_31 = arith.constant dense<0.000000e+00> : vector<32x8xf32>
    %46 = tpu.matmul %44, %38, %cst_31 {dimension_numbers = #tpu.dot_dimension_numbers<[1], [0], [0], [1], [0, 0, 1, 1], [], []>} : vector<32x16xf32>, vector<16x8xf32>, vector<32x8xf32> -> vector<32x8xf32>
    %47 = vector.broadcast %39 : vector<1x8xf32> to vector<32x8xf32>
    %48 = arith.addf %46, %47 : vector<32x8xf32>
    %cst_32 = arith.constant 0.000000e+00 : f32
    %49 = vector.broadcast %cst_32 : f32 to vector<32x8xf32>
    %50 = arith.cmpf ogt, %48, %49 : vector<32x8xf32>
    %cst_33 = arith.constant 0.00999999977 : f32
    %51 = vector.broadcast %cst_33 : f32 to vector<32x8xf32>
    %52 = arith.mulf %51, %48 : vector<32x8xf32>
    %53 = arith.select %50, %48, %52 : vector<32x8xi1>, vector<32x8xf32>
    %cst_34 = arith.constant dense<0.000000e+00> : vector<32x8xf32>
    %54 = tpu.matmul %45, %40, %cst_34 {dimension_numbers = #tpu.dot_dimension_numbers<[1], [0], [0], [1], [0, 0, 1, 1], [], []>} : vector<32x16xf32>, vector<16x8xf32>, vector<32x8xf32> -> vector<32x8xf32>
    %55 = vector.broadcast %41 : vector<1x8xf32> to vector<32x8xf32>
    %56 = arith.addf %54, %55 : vector<32x8xf32>
    %cst_35 = arith.constant 0.000000e+00 : f32
    %57 = vector.broadcast %cst_35 : f32 to vector<32x8xf32>
    %58 = arith.cmpf ogt, %56, %57 : vector<32x8xf32>
    %cst_36 = arith.constant 0.00999999977 : f32
    %59 = vector.broadcast %cst_36 : f32 to vector<32x8xf32>
    %60 = arith.mulf %59, %56 : vector<32x8xf32>
    %61 = arith.select %58, %56, %60 : vector<32x8xi1>, vector<32x8xf32>
    %62 = arith.addf %53, %61 : vector<32x8xf32>
    %63 = arith.mulf %62, %62 : vector<32x8xf32>
    %cst_37 = arith.constant dense<0.000000e+00> : vector<32xf32>
    %64 = vector.multi_reduction <add>, %63, %cst_37 [1] : vector<32x8xf32> to vector<32xf32>
    %65 = vector.shape_cast %64 : vector<32xf32> to vector<32x1xf32>
    %cst_38 = arith.constant 1.000000e-24 : f32
    %66 = vector.broadcast %cst_38 : f32 to vector<32x1xf32>
    %67 = arith.addf %65, %66 : vector<32x1xf32>
    %68 = math.rsqrt %67 : vector<32x1xf32>
    %69 = vector.broadcast %68 : vector<32x1xf32> to vector<32x8xf32>
    %70 = arith.mulf %62, %69 : vector<32x8xf32>
    %c0_39 = arith.constant 0 : index
    %c48 = arith.constant 48 : index
    %71 = vector.load %arg12[%c0_39, %c48] : memref<32x56xf32, #tpu.memory_space<vmem>>, vector<32x8xf32>
    tpu.vector_store %arg12[%c0_39, %c48], %70 {strides = array<i32>} : memref<32x56xf32, #tpu.memory_space<vmem>>, vector<32x8xf32>,
    %72 = tpu.iota {dimensions = array<i32: 1>} : vector<24x32xi32>
    %c0_40 = arith.constant 0 : index
    %c0_41 = arith.constant 0 : index
    %73 = vector.load %arg10[%c0_40, %c0_41] : memref<24x1xi32, #tpu.memory_space<vmem>>, vector<24x1xi32>
    %74 = vector.broadcast %73 : vector<24x1xi32> to vector<24x32xi32>
    %75 = arith.cmpi eq, %72, %74 : vector<24x32xi32>
    %76 = arith.extui %75 : vector<24x32xi1> to vector<24x32xi32>
    %77 = arith.sitofp %76 : vector<24x32xi32> to vector<24x32xf32>
    %c0_42 = arith.constant 0 : index
    %c0_43 = arith.constant 0 : index
    %78 = vector.load %arg12[%c0_42, %c0_43] : memref<32x56xf32, #tpu.memory_space<vmem>>, vector<32x56xf32>
    %cst_44 = arith.constant dense<0.000000e+00> : vector<24x56xf32>
    %79 = tpu.matmul %77, %78, %cst_44 {dimension_numbers = #tpu.dot_dimension_numbers<[1], [0], [0], [1], [0, 0, 1, 1], [], []>} : vector<24x32xf32>, vector<32x56xf32>, vector<24x56xf32> -> vector<24x56xf32>
    %80 = vector.extract_strided_slice %79 {offsets = [0, 0], sizes = [8, 56], strides = [1, 1]} : vector<24x56xf32> to vector<8x56xf32>
    %81 = vector.extract_strided_slice %79 {offsets = [8, 0], sizes = [16, 56], strides = [1, 1]} : vector<24x56xf32> to vector<16x56xf32>
    %cst_45 = arith.constant dense<0.000000e+00> : vector<8x16xf32>
    %82 = tpu.matmul %80, %81, %cst_45 {dimension_numbers = #tpu.dot_dimension_numbers<[1], [1], [0], [0], [0, 0, 1, 0], [], []>} : vector<8x56xf32>, vector<16x56xf32>, vector<8x16xf32> -> vector<8x16xf32>
    %c0_46 = arith.constant 0 : index
    %c0_47 = arith.constant 0 : index
    %83 = vector.load %arg11[%c0_46, %c0_47] : memref<8x16xf32, #tpu.memory_space<vmem>>, vector<8x16xf32>
    tpu.vector_store %arg11[%c0_46, %c0_47], %82 {strides = array<i32>} : memref<8x16xf32, #tpu.memory_space<vmem>>, vector<8x16xf32>,
    return
  }
}

</mosaic_0001>

<bundles_post_ra>
// kernel: tpu_custom_call.1
= control target key start
LH: loop header
LB: loop body
LE: loop exit
PB: predicated region body
PF: predicated region fallthrough
CT: control target
= control target key end

     0   :  { %vm50_vm0 = vcmask 261120   ;;  %s1484_s0 = inlined_call_operand.vmem [shape: f32[32,32], index: 0, kind: input, shape index: {}]   ;;  %s1485_s1 = inlined_call_operand.vmem [shape: f32[32,32], index: 1, kind: input, shape index: {}]   ;;  %s1486_s2 = inlined_call_operand.vmem [shape: f32[32,16], index: 2, kind: input, shape index: {}]   ;;  %s1487_s3 = inlined_call_operand.vmem [shape: f32[1,16], index: 3, kind: input, shape index: {}]   ;;  %s1488_s4 = inlined_call_operand.vmem [shape: f32[32,16], index: 4, kind: input, shape index: {}]   ;;  %s1489_s5 = inlined_call_operand.vmem [shape: f32[1,16], index: 5, kind: input, shape index: {}]   ;;  %s1490_s6 = inlined_call_operand.vmem [shape: f32[16,8], index: 6, kind: input, shape index: {}]   ;;  %s1491_s7 = inlined_call_operand.vmem [shape: f32[1,8], index: 7, kind: input, shape index: {}]   ;;  %s1492_s8 = inlined_call_operand.vmem [shape: f32[16,8], index: 8, kind: input, shape index: {}]   ;;  %s1493_s9 = inlined_call_operand.vmem [shape: f32[1,8], index: 9, kind: input, shape index: {}]   ;;  %s1494_s10 = inlined_call_operand.vmem [shape: s32[24,1], index: 10, kind: input, shape index: {}]   ;;  %s1495_s11 = inlined_call_operand.hbm [shape: f32[8,16], index: 11, kind: output, shape index: {}]  }
   0x1   :  { %v40_v0 = vld [vmem:[%s1484_s0] sm:$0xff]  ;;  %v41_v1 = vld [vmem:[%s1484_s0 + $0x8] sm:$0xff]  ;;  %v42_v2 = vld [vmem:[%s1484_s0 + $0x10] sm:$0xff] }
   0x2   :  { %v65_v3 = vpack.c.bf16 %v41_v1, %v40_v0  ;;  %v43_v4 = vld [vmem:[%s1484_s0 + $0x18] sm:$0xff]  ;;  %v44_v5 = vld [vmem:[%s1485_s1] sm:$0xff]  ;;  %v45_v6 = vld [vmem:[%s1485_s1 + $0x8] sm:$0xff]  ;;  %51 = vst.msk [vmem:[#allocation2] sm:$0xff] %vm50_vm0, %v40_v0 }
   0x3   :  { %52 = vst.msk [vmem:[#allocation2 + $0x8] sm:$0xff] %vm50_vm0, %v41_v1  ;;  %53 = vst.msk [vmem:[#allocation2 + $0x10] sm:$0xff] %vm50_vm0, %v42_v2  ;;  %v66_v7 = vpack.c.bf16 %v43_v4, %v42_v2  ;;  %v48_v8 = vpack.c.bf16 %v45_v6, %v44_v5  ;;  %v55_v9 = vld [vmem:[%s1486_s2] sm:$0xff]  ;;  %v56_v10 = vld [vmem:[%s1486_s2 + $0x8] sm:$0xff] }
   0x4   :  { %54 = vst.msk [vmem:[#allocation2 + $0x18] sm:$0xff] %vm50_vm0, %v43_v4  ;;  %1053 = vmatprep.subr.bf16.mxu0 %v65_v3  ;;  %v60_v11 = vld [vmem:[%s1488_s4] sm:$0xff]  ;;  %v61_v12 = vld [vmem:[%s1488_s4 + $0x8] sm:$0xff]  ;;  %v46_v13 = vld [vmem:[%s1485_s1 + $0x10] sm:$0xff]  ;;  %v1141_v15 = vpack.c.bf16 %v56_v10, %v55_v9 }
   0x5   :  { %1054 = vmatpush3.bf16.msra.mxu0 %v65_v3  ;;  %1057 = vmatprep.mubr.msk.bf16.mxu0 %vm50_vm0, %v48_v8  ;;  %v47_v14 = vld [vmem:[%s1485_s1 + $0x18] sm:$0xff] }
   0x6   :  { %16 = vsyncpa [#allocation4], 0  ;;  %1055 = vmatprep.subr.bf16.mxu0 %v66_v7  ;;  %v1149_v16 = vpack.c.bf16 %v61_v12, %v60_v11  ;;  %1142 = vmatprep.subr.bf16.mxu1 %v1141_v15  ;;  %v1332_v17 = vpack.c.bf16 %v47_v14, %v46_v13  ;;  %v57_v18 = vld [vmem:[%s1486_s2 + $0x10] sm:$0xff]  ;;  %v58_v19 = vld [vmem:[%s1486_s2 + $0x18] sm:$0xff]  ;;  %vm368_vm5 = vcmask 130048   ;;  %vm717_vm14 = vcmask 64512  }
   0x7   :  { %1144 = vmatpush3.bf16.msra.mxu1 %v1141_v15  ;;  %v62_v20 = vld [vmem:[%s1488_s4 + $0x10] sm:$0xff]  ;;  %v1145_v21 = vpack.c.bf16 %v58_v19, %v57_v18  ;;  %v63_v22 = vld [vmem:[%s1488_s4 + $0x18] sm:$0xff]  ;;  %v976_v36 = vld [vmem:[%s1487_s3] ss:$0 sm:$0xff] }
   0x8   :  { %v1153_v23 = vpack.c.bf16 %v63_v22, %v62_v20  ;;  %v981_v37 = vld [vmem:[%s1489_s5] ss:$0 sm:$0xff]  ;;  %v415_v22 = vld [vmem:[%s1490_s6 + $0x8] sm:$0xff] }
   0x9   :  { %1056 = vmatpush3.bf16.msra.mxu0 %v66_v7  ;;  %1146 = vmatprep.subr.bf16.mxu1 %v1145_v21 }
   0xa   :  { %1150 = vmatprep.subr.bf16.mxu0 %v1149_v16 }
   0xb   :  { %1148 = vmatpush3.bf16.msra.mxu1 %v1145_v21  ;;  %v414_v21 = vld [vmem:[%s1490_s6] sm:$0xff] }
   0xc   :  { %1058 = vmatmul.mubr.msk.bf16.vlgmr.msra.gmra.mrb[0].mxu0 %vm50_vm0, %v1332_v17 }
   0xd   :  { %1152 = vmatpush3.bf16.msra.mxu0 %v1149_v16 }
   0xe   :  { %1154 = vmatprep.subr.bf16.mxu0 %v1153_v23 }
  0x11   :  { %1156 = vmatpush3.bf16.msra.mxu0 %v1153_v23  ;;  %v417_v23 = vld [vmem:[%s1492_s8] sm:$0xff] }
  0xdf   :  { %v1059_v24 = vpop.f32.mrb[0].mxu0 }
  0xe0   :  { %v107_v25 = vpop.f32.mrb[1].mxu0  ;;  %v124_v32 = vadd.f32 %v1059_v24, %v42_v2  ;;  %v128_v33 = vmul.f32 %v1059_v24, %v42_v2  ;;  %v1157_v24 = vpack.c.bf16 %v415_v22, %v414_v21 }
  0xe1   :  { %v126_v26 = vmul.f32 %v107_v25, %v40_v0  ;;  %v1060_v27 = vpop.f32.mrb[2].mxu0  ;;  %v122_v28 = vadd.f32 %v107_v25, %v40_v0  ;;  %v418_v25 = vld [vmem:[%s1492_s8 + $0x8] sm:$0xff] }
  0xe2   :  { %v110_v29 = vpop.f32.mrb[3].mxu0  ;;  %v125_v34 = vadd.f32 %v1060_v27, %v43_v4  ;;  %v129_v35 = vmul.f32 %v1060_v27, %v43_v4  ;;  %1158 = vmatprep.subr.bf16.mxu0 %v1157_v24 }
  0xe3   :  { %v123_v30 = vadd.f32 %v110_v29, %v41_v1  ;;  %v127_v31 = vmul.f32 %v110_v29, %v41_v1  ;;  %1069 = vmatprep.mubr.msk.f32.mxu1 %vm50_vm0, %v122_v28  ;;  %1083 = vmatprep.mubr.msk.f32.mxu0 %vm50_vm0, %v126_v26  ;;  %v1161_v26 = vpack.c.bf16 %v418_v25, %v417_v23 }
  0xe5   :  { %1070 = vmatmul.mubr.msk.f32.vlgmr.msra.gmra.mrb[0].mxu1 %vm50_vm0, %v123_v30  ;;  %1084 = vmatmul.mubr.msk.f32.vlgmr.msra.gmra.mrb[4].mxu0 %vm50_vm0, %v127_v31 }
  0xe6   :  { %1072 = vmatprep.mubr.msk.f32.mxu1 %vm50_vm0, %v124_v32  ;;  %1086 = vmatprep.mubr.msk.f32.mxu0 %vm50_vm0, %v128_v33 }
  0xe7   :  { %1160 = vmatpush3.bf16.msra.mxu0 %v1157_v24 }
  0xe9   :  { %1073 = vmatmul.mubr.msk.f32.gmra.mrb[2].mxu1 %vm50_vm0, %v125_v34  ;;  %1087 = vmatmul.mubr.msk.f32.gmra.mrb[6].mxu0 %vm50_vm0, %v129_v35 }
  0xea   :  { %1093 = vmatprep.mubr.msk.bf16.mxu1 %vm50_vm0, %v48_v8 }
 0x1b8   :  { %v1071_v38 = vpop.f32.mrb[0].mxu1  ;;  %v1085_v39 = vpop.f32.mrb[4].mxu0 }
 0x1b9   :  { %v220_v40 = vadd.f32 %v1071_v38, %v976_v36  ;;  %v335_v41 = vadd.f32 %v1085_v39, %v981_v37  ;;  %v214_v42 = vpop.f32.mrb[1].mxu1  ;;  %v329_v43 = vpop.f32.mrb[5].mxu0  ;;  %v988_v38 = vld [vmem:[%s1491_s7] ss:$0 sm:$0xff]  ;;  %s1224_s7 = smov 32  }
 0x1ba   :  { %v215_v44 = vadd.f32 %v976_v36, %v214_v42  ;;  %v330_v45 = vadd.f32 %v981_v37, %v329_v43  ;;  %v993_v39 = vld [vmem:[%s1493_s9] ss:$0 sm:$0xff]  ;;  %s1227_s9 = smov 48  }
 0x1bb   :  { %vm234_vm1 = vcmp.gt.f32.partialorder %v220_v40, 0.0  ;;  %v238_v46 = vmul.f32 0.01, %v220_v40  ;;  %vm349_vm2 = vcmp.gt.f32.partialorder %v335_v41, 0.0  ;;  %v353_v47 = vmul.f32 0.01, %v335_v41 }
 0x1bc   :  { %vm233_vm3 = vcmp.gt.f32.partialorder %v215_v44, 0.0  ;;  %v237_v48 = vmul.f32 0.01, %v215_v44  ;;  %vm348_vm4 = vcmp.gt.f32.partialorder %v330_v45, 0.0  ;;  %v352_v49 = vmul.f32 0.01, %v330_v45 }
 0x1bd   :  { %v242_v50 = vsel %vm234_vm1, %v220_v40, %v238_v46  ;;  %v357_v51 = vsel %vm349_vm2, %v335_v41, %v353_v47  ;;  %v1074_v52 = vpop.f32.mrb[2].mxu1  ;;  %v1088_v53 = vpop.f32.mrb[6].mxu0 }
 0x1be   :  { %v1363_v54 = vadd.f32 %v357_v51, %v242_v50  ;;  %v241_v55 = vsel %vm233_vm3, %v215_v44, %v237_v48  ;;  %v356_v56 = vsel %vm348_vm4, %v330_v45, %v352_v49  ;;  %v230_v57 = vadd.f32 %v1074_v52, %v976_v36  ;;  %v224_v58 = vpop.f32.mrb[3].mxu1  ;;  %v339_v59 = vpop.f32.mrb[7].mxu0 }
 0x1bf   :  { %v1365_v60 = vadd.f32 %v356_v56, %v241_v55  ;;  %v345_v61 = vadd.f32 %v1088_v53, %v981_v37  ;;  %v225_v62 = vadd.f32 %v976_v36, %v224_v58  ;;  %v340_v63 = vadd.f32 %v981_v37, %v339_v59 }
 0x1c0   :  { %vm236_vm6 = vcmp.gt.f32.partialorder %v230_v57, 0.0  ;;  %v240_v0 = vmul.f32 0.01, %v230_v57  ;;  %v365_v1 = vmul.f32 %v1363_v54, %v1363_v54  ;;  %vm409_vm4 = vcmask 392448  }
 0x1c1   :  { %vm351_vm7 = vcmp.gt.f32.partialorder %v345_v61, 0.0  ;;  %v355_v2 = vmul.f32 0.01, %v345_v61  ;;  %vm235_vm8 = vcmp.gt.f32.partialorder %v225_v62, 0.0  ;;  %v239_v3 = vmul.f32 0.01, %v225_v62 }
 0x1c2   :  { %v244_v4 = vsel %vm236_vm6, %v230_v57, %v240_v0  ;;  %vm350_vm9 = vcmp.gt.f32.partialorder %v340_v63, 0.0  ;;  %v354_v5 = vmul.f32 0.01, %v340_v63  ;;  %v372_v6 = vsel %vm368_vm5, %v365_v1, 0.0 }
 0x1c3   :  { %v359_v7 = vsel %vm351_vm7, %v345_v61, %v355_v2  ;;  %v243_v8 = vsel %vm235_vm8, %v225_v62, %v239_v3  ;;  %373 = vadd.xlane.f32.xlu0 %v372_v6  ;;  %v420_v9 = vpack.c.bf16 %v1363_v54, %v1365_v60  ;;  %v364_v10 = vmul.f32 %v1365_v60, %v1365_v60 }
 0x1c4   :  { %v1374_v11 = vadd.f32 %v359_v7, %v244_v4  ;;  %v358_v12 = vsel %vm350_vm9, %v340_v63, %v354_v5  ;;  %vm1228_vm6 = vmmov 0   ;;  %vm758_vm7 = vcmask 458112  }
 0x1c5   :  { %v1376_v13 = vadd.f32 %v358_v12, %v243_v8  ;;  %1089 = vmatprep.subr.bf16.mxu1 %v420_v9  ;;  %v369_v15 = vsel %vm368_vm5, %v364_v10, 0.0 }
 0x1c6   :  { %1090 = vmatpush3.bf16.msra.mxu1 %v420_v9  ;;  %v367_v14 = vmul.f32 %v1374_v11, %v1374_v11 }
 0x1c7   :  { %v421_v16 = vpack.c.bf16 %v1374_v11, %v1376_v13  ;;  %370 = vadd.xlane.f32.xlu0 %v369_v15  ;;  %v366_v18 = vmul.f32 %v1376_v13, %v1376_v13 }
 0x1c8   :  { %v378_v19 = vsel %vm368_vm5, %v367_v14, 0.0 }
 0x1c9   :  { %379 = vadd.xlane.f32.xlu1 %v378_v19  ;;  %1091 = vmatprep.subr.bf16.mxu1 %v421_v16  ;;  %v375_v20 = vsel %vm368_vm5, %v366_v18, 0.0 }
 0x1ca   :  { %1092 = vmatpush3.bf16.msra.mxu1 %v421_v16 }
 0x1cb   :  { %376 = vadd.xlane.f32.xlu0 %v375_v20  ;;  %1162 = vmatprep.subr.bf16.mxu1 %v1161_v26 }
 0x1cd   :  { %1094 = vmatmul.mubr.msk.bf16.vlgmr.msra.gmra.mrb[4].mxu1 %vm50_vm0, %v1332_v17 }
 0x1ce   :  { %1164 = vmatpush3.bf16.msra.mxu1 %v1161_v26 }
 0x250   :  { %v374_v6 = vpop.xlane.xlu0 %373 }
 0x251   :  { %v382_v26 = vadd.f32 1e-24, %v374_v6 }
 0x253   :  { %1184 = vrsqrt.f32 %v382_v26 }
 0x254   :  { %v371_v22 = vpop.xlane.xlu0 %370 }
 0x2a0   :  { %v1095_v17 = vpop.f32.mrb[4].mxu1 }
 0x2a1   :  { %v456_v27 = vpop.f32.mrb[5].mxu1  ;;  %v473_v34 = vadd.f32 %v1095_v17, %v1376_v13  ;;  %v477_v35 = vmul.f32 %v1095_v17, %v1376_v13  ;;  %v380_v17 = vpop.xlane.xlu1 %379 }
 0x2a2   :  { %v471_v28 = vadd.f32 %v456_v27, %v1365_v60  ;;  %v475_v29 = vmul.f32 %v456_v27, %v1365_v60  ;;  %v1096_v30 = vpop.f32.mrb[6].mxu1  ;;  %v381_v27 = vadd.f32 1e-24, %v371_v22 }
 0x2a3   :  { %v459_v31 = vpop.f32.mrb[7].mxu1  ;;  %v474_v36 = vadd.f32 %v1096_v30, %v1374_v11  ;;  %v478_v37 = vmul.f32 %v1096_v30, %v1374_v11  ;;  %v384_v30 = vadd.f32 1e-24, %v380_v17 }
 0x2a4   :  { %v472_v32 = vadd.f32 %v459_v31, %v1363_v54  ;;  %v476_v33 = vmul.f32 %v459_v31, %v1363_v54  ;;  %1101 = vmatprep.mubr.msk.f32.mxu0 %vm368_vm5, %v471_v28  ;;  %1111 = vmatprep.mubr.msk.f32.mxu1 %vm368_vm5, %v475_v29  ;;  %v377_v29 = vpop.xlane.xlu0 %376  ;;  %1186 = vrsqrt.f32 %v381_v27 }
 0x2a5   :  { %v383_v31 = vadd.f32 1e-24, %v377_v29  ;;  %1188 = vrsqrt.f32 %v384_v30 }
 0x2a6   :  { %1102 = vmatmul.mubr.msk.f32.vlgmr.msra.gmra.mrb[8].mxu0 %vm368_vm5, %v472_v32  ;;  %1112 = vmatmul.mubr.msk.f32.vlgmr.msra.gmra.mrb[8].mxu1 %vm368_vm5, %v476_v33  ;;  %v1185_v32 = vpop.eup %1184 }
 0x2a7   :  { %1104 = vmatprep.mubr.msk.f32.mxu0 %vm368_vm5, %v473_v34  ;;  %1114 = vmatprep.mubr.msk.f32.mxu1 %vm368_vm5, %v477_v35  ;;  %1190 = vrsqrt.f32 %v383_v31  ;;  %v390_v34 = vmul.f32 %v1185_v32, %v1363_v54 }
 0x2aa   :  { %1105 = vmatmul.mubr.msk.f32.gmra.mrb[10].mxu0 %vm368_vm5, %v474_v36  ;;  %1115 = vmatmul.mubr.msk.f32.gmra.mrb[10].mxu1 %vm368_vm5, %v478_v37 }
 0x2ae   :  { %v1187_v33 = vpop.eup %1186 }
 0x2af   :  { %v1189_v35 = vpop.eup %1188  ;;  %v389_v36 = vmul.f32 %v1187_v33, %v1365_v60 }
 0x2b1   :  { %v1191_v37 = vpop.eup %1190 }
 0x379   :  { %v1103_v40 = vpop.f32.mrb[8].mxu0  ;;  %v1113_v41 = vpop.f32.mrb[8].mxu1 }
 0x37a   :  { %v569_v42 = vadd.f32 %v1103_v40, %v988_v38  ;;  %v684_v43 = vadd.f32 %v1113_v41, %v993_v39  ;;  %v563_v44 = vpop.f32.mrb[9].mxu0  ;;  %v678_v45 = vpop.f32.mrb[9].mxu1  ;;  %v1225_v40 = vmov 0  }
 0x37b   :  { %v564_v46 = vadd.f32 %v988_v38, %v563_v44  ;;  %v679_v47 = vadd.f32 %v993_v39, %v678_v45  ;;  %1182 = vset.pattern.permute.xlu0 %v1225_v40  ;;  %1183 = vset.pattern.permute.xlu1 %v1225_v40 }
 0x37c   :  { %vm583_vm10 = vcmp.gt.f32.partialorder %v569_v42, 0.0  ;;  %v587_v48 = vmul.f32 0.01, %v569_v42  ;;  %vm698_vm11 = vcmp.gt.f32.partialorder %v684_v43, 0.0  ;;  %v702_v49 = vmul.f32 0.01, %v684_v43 }
 0x37d   :  { %vm582_vm12 = vcmp.gt.f32.partialorder %v564_v46, 0.0  ;;  %v586_v50 = vmul.f32 0.01, %v564_v46  ;;  %vm697_vm13 = vcmp.gt.f32.partialorder %v679_v47, 0.0  ;;  %v701_v51 = vmul.f32 0.01, %v679_v47 }
 0x37e   :  { %v591_v52 = vsel %vm583_vm10, %v569_v42, %v587_v48  ;;  %v706_v53 = vsel %vm698_vm11, %v684_v43, %v702_v49  ;;  %v1106_v55 = vpop.f32.mrb[10].mxu0  ;;  %v1116_v56 = vpop.f32.mrb[10].mxu1  ;;  %v1226_v48 = vmov 0.0|0.0   ;;  %vm879_vm11 = vcmask 457728  }
 0x37f   :  { %v590_v57 = vsel %vm582_vm12, %v564_v46, %v586_v50  ;;  %v705_v58 = vsel %vm697_vm13, %v679_v47, %v701_v51  ;;  %v579_v59 = vadd.f32 %v1106_v55, %v988_v38  ;;  %v694_v61 = vadd.f32 %v1116_v56, %v993_v39  ;;  %v573_v62 = vpop.f32.mrb[11].mxu0  ;;  %v688_v63 = vpop.f32.mrb[11].mxu1  ;;  %1165 = vmatprep.subr.bf16.mxu0 %v1226_v48  ;;  %vm1173_vm12 = vmpackc.low %vm879_vm11, %vm879_vm11 }
 0x380   :  { %v574_v0 = vadd.f32 %v988_v38, %v573_v62  ;;  %v689_v1 = vadd.f32 %v993_v39, %v688_v63  ;;  %v1423_v2 = vadd.f32 %v706_v53, %v591_v52  ;;  %v1425_v3 = vadd.f32 %v705_v58, %v590_v57  ;;  %1171 = vmatprep.subr.bf16.mxu1 %v1226_v48  ;;  %v767_v63 = vld [vmem:[%s1494_s10 + $0x10] sm:$0xff] }
 0x381   :  { %vm585_vm15 = vcmp.gt.f32.partialorder %v579_v59, 0.0  ;;  %v589_v4 = vmul.f32 0.01, %v579_v59  ;;  %vm700_vm1 = vcmp.gt.f32.partialorder %v694_v61, 0.0  ;;  %v704_v5 = vmul.f32 0.01, %v694_v61 }
 0x382   :  { %vm584_vm2 = vcmp.gt.f32.partialorder %v574_v0, 0.0  ;;  %v588_v7 = vmul.f32 0.01, %v574_v0  ;;  %vm699_vm3 = vcmp.gt.f32.partialorder %v689_v1, 0.0  ;;  %v703_v8 = vmul.f32 0.01, %v689_v1 }
 0x383   :  { %v593_v9 = vsel %vm585_vm15, %v579_v59, %v589_v4  ;;  %v708_v10 = vsel %vm700_vm1, %v694_v61, %v704_v5  ;;  %v714_v12 = vmul.f32 %v1423_v2, %v1423_v2  ;;  %v713_v19 = vmul.f32 %v1425_v3, %v1425_v3  ;;  %v765_v59 = vld [vmem:[%s1494_s10] sm:$0xff]  ;;  %v766_v61 = vld [vmem:[%s1494_s10 + $0x8] sm:$0xff]  ;;  %s1230_s10 = smov [#allocation3]  }
 0x384   :  { %v592_v14 = vsel %vm584_vm2, %v574_v0, %v588_v7  ;;  %v707_v15 = vsel %vm699_vm3, %v689_v1, %v703_v8  ;;  %v1429_v16 = vadd.f32 %v708_v10, %v593_v9  ;;  %v392_v38 = vmul.f32 %v1189_v35, %v1374_v11  ;;  %s966_s1 = sshll.u32 %s1230_s10, 4  ;;  %s967_s1 = int_to_ptr.vmem [resolvable:$true] %s966_s1 }
 0x385   :  { %v721_v18 = vsel %vm717_vm14, %v714_v12, 0.0  ;;  %v1434_v20 = vadd.f32 %v707_v15, %v592_v14  ;;  %v718_v23 = vsel %vm717_vm14, %v713_v19, 0.0  ;;  %v391_v39 = vmul.f32 %v1191_v37, %v1376_v13  ;;  %s1200_s24 = scalar_lea.vmem %s967_s1, 128  ;;  %p1205_p1 = scmp.lt.s32.totalorder %s967_s1, %s967_s1 }
 0x386   :  { %722 = vadd.xlane.f32.xlu1 %v721_v18  ;;  %v716_v25 = vmul.f32 %v1429_v16, %v1429_v16  ;;  %v1229_v62 = vmov 0.0   ;;  %v763_v7 = vlaneseq  ;;  %p1201_p0 = scmp.ne.s32.totalorder %s967_s1, %s1200_s24  ;;  %p1206_p2 = scmp.lt.s32.totalorder %s1200_s24, %s1200_s24 }
 0x387   :  { %v715_v21 = vmul.f32 %v1434_v20, %v1434_v20  ;;  %1125 = vmatprep.mubr.msk.f32.mxu0 %vm1228_vm6, %v1229_v62  ;;  %1138 = vmatprep.mubr.msk.f32.mxu1 %vm1228_vm6, %v1229_v62 }
 0x388   :  { %v727_v28 = vsel %vm717_vm14, %v716_v25, 0.0  ;;  %v764_v12 = vand.u32 127, %v763_v7  ;;  %p1207_p3 = por %p1206_p2, %p1205_p1 }
 0x389   :  { %v724_v24 = vsel %vm717_vm14, %v715_v21, 0.0 }
 0x38a   :  { %719 = vadd.xlane.f32.xlu1 %v718_v23  ;;  %725 = vadd.xlane.f32.xlu0 %v724_v24  ;;  %p1208_p4 = pnand %p1207_p3, %p1201_p0 }
 0x38e   :  { %728 = vadd.xlane.f32.xlu1 %v727_v28 }
 0x39f   :  { %399 = vrot.lane.b32.xlu1 %v390_v34, %s1224_s7 }
 0x3a0   :  { %397 = vrot.lane.b32.xlu0 %v389_v36, %s1224_s7 }
 0x3a3   :  { %403 = vrot.lane.b32.xlu1 %v392_v38, %s1224_s7 }
 0x3a4   :  { %401 = vrot.lane.b32.xlu0 %v391_v39, %s1224_s7 }
 0x413   :  { %v723_v41 = vpop.xlane.xlu1 %722 }
 0x414   :  { %v731_v42 = vadd.f32 1e-24, %v723_v41 }
 0x416   :  { %1192 = vrsqrt.f32 %v731_v42 }
 0x417   :  { %v720_v54 = vpop.xlane.xlu1 %719  ;;  %v726_v43 = vpop.xlane.xlu0 %725 }
 0x418   :  { %v730_v44 = vadd.f32 1e-24, %v720_v54  ;;  %v732_v60 = vadd.f32 1e-24, %v726_v43 }
 0x41a   :  { %1194 = vrsqrt.f32 %v730_v44 }
 0x41b   :  { %1196 = vrsqrt.f32 %v732_v60  ;;  %v729_v45 = vpop.xlane.xlu1 %728  ;;  %v398_v46 = vpop.permute.xlu0 %397 }
 0x41c   :  { %v733_v11 = vadd.f32 1e-24, %v729_v45  ;;  %410 = vst.msk [vmem:[#allocation2] sm:$0xff] %vm409_vm4, %v398_v46 }
 0x41e   :  { %1198 = vrsqrt.f32 %v733_v11 }
 0x41f   :  { %v400_v13 = vpop.permute.xlu1 %399  ;;  %v402_v47 = vpop.permute.xlu0 %401 }
 0x420   :  { %v1193_v49 = vpop.eup %1192  ;;  %411 = vst.msk [vmem:[#allocation2 + $0x8] sm:$0xff] %vm409_vm4, %v400_v13  ;;  %412 = vst.msk [vmem:[#allocation2 + $0x10] sm:$0xff] %vm409_vm4, %v402_v47 }
 0x421   :  { %v739_v50 = vmul.f32 %v1193_v49, %v1423_v2 }
 0x423   :  { %748 = vrot.lane.b32.xlu1 %v739_v50, %s1227_s9  ;;  %v404_v51 = vpop.permute.xlu1 %403 }
 0x424   :  { %v1195_v52 = vpop.eup %1194  ;;  %413 = vst.msk [vmem:[#allocation2 + $0x18] sm:$0xff] %vm409_vm4, %v404_v51 }
 0x425   :  { %v1197_v53 = vpop.eup %1196  ;;  %v738_v55 = vmul.f32 %v1195_v52, %v1425_v3 }
 0x426   :  { %v740_v56 = vmul.f32 %v1197_v53, %v1434_v20 }
 0x427   :  { %746 = vrot.lane.b32.xlu1 %v738_v55, %s1227_s9 }
 0x428   :  { %v1199_v57 = vpop.eup %1198  ;;  %750 = vrot.lane.b32.xlu0 %v740_v56, %s1227_s9 }
 0x429   :  { %v741_v58 = vmul.f32 %v1199_v57, %v1429_v16 }
 0x42b   :  { %752 = vrot.lane.b32.xlu1 %v741_v58, %s1227_s9 }
 0x42c   :  { %769 = vperm.xlu0 %1182, %v765_v59  }
 0x42f   :  { %772 = vperm.xlu1 %1183, %v766_v61  }
 0x433   :  { %775 = vperm.xlu1 %1183, %v767_v63  }
 0x495   :  { %v749_v0 = vpop.permute.xlu1 %748 }
 0x496   :  { %760 = vst.msk [vmem:[#allocation2 + $0x8] sm:$0xff] %vm758_vm7, %v749_v0 }
 0x499   :  { %v747_v1 = vpop.permute.xlu1 %746 }
 0x49a   :  { %759 = vst.msk [vmem:[#allocation2] sm:$0xff] %vm758_vm7, %v747_v1  ;;  %v751_v2 = vpop.permute.xlu0 %750 }
 0x49b   :  { %761 = vst.msk [vmem:[#allocation2 + $0x10] sm:$0xff] %vm758_vm7, %v751_v2 }
 0x49d   :  { %v753_v3 = vpop.permute.xlu1 %752  ;;  %v787_v5 = vld [vmem:[#allocation2 + $0x8] sm:$0xff] }
 0x49e   :  { %762 = vst.msk [vmem:[#allocation2 + $0x18] sm:$0xff] %vm758_vm7, %v753_v3 }
 0x4a1   :  { %v786_v4 = vld [vmem:[#allocation2] sm:$0xff] }
 0x4a2   :  { %v1166_v6 = vpack.c.bf16 %v787_v5, %v786_v4  ;;  %v788_v8 = vld [vmem:[#allocation2 + $0x10] sm:$0xff] }
 0x4a4   :  { %1167 = vmatpush3.bf16.msra.mxu0 %v1166_v6 }
 0x4a5   :  { %1168 = vmatprep.subr.bf16.mxu0 %v1226_v48  ;;  %v789_v9 = vld [vmem:[#allocation2 + $0x18] sm:$0xff] }
 0x4a6   :  { %v1169_v10 = vpack.c.bf16 %v789_v9, %v788_v8 }
 0x4a8   :  { %1170 = vmatpush3.bf16.msra.mxu0 %v1169_v10 }
 0x4ab   :  { %v770_v14 = vpop.permute.xlu0 %769 }
 0x4ac   :  { %vm777_vm8 = vcmp.eq.s32.totalorder %v764_v12, %v770_v14 }
 0x4ad   :  { %v998_v15 = vsel %vm777_vm8, 1.0, %v1229_v62 }
 0x4ae   :  { %v773_v16 = vpop.permute.xlu1 %772  ;;  %1126 = vmatmul.mubr.msk.f32.vlgmr.msra.gmra.mrb[12].mxu0 %vm50_vm0, %v998_v15 }
 0x4af   :  { %vm778_vm9 = vcmp.eq.s32.totalorder %v764_v12, %v773_v16  ;;  %1128 = vmatprep.mubr.msk.f32.mxu0 %vm1228_vm6, %v1229_v62 }
 0x4b0   :  { %v999_v18 = vsel %vm778_vm9, 1.0, %v1229_v62 }
 0x4b2   :  { %v776_v19 = vpop.permute.xlu1 %775  ;;  %1129 = vmatmul.mubr.msk.f32.gmra.mrb[14].mxu0 %vm50_vm0, %v999_v18 }
 0x4b3   :  { %vm779_vm10 = vcmp.eq.s32.totalorder %v764_v12, %v776_v19  ;;  %1131 = vmatprep.mubr.msk.f32.mxu0 %vm1228_vm6, %v1229_v62 }
 0x4b4   :  { %v1000_v20 = vsel %vm779_vm10, 1.0, %v1229_v62 }
 0x4b6   :  { %1132 = vmatmul.mubr.msk.f32.gmra.mrb[16].mxu0 %vm50_vm0, %v1000_v20 }
 0x581   :  { %v865_v21 = vpop.f32.mrb[12].mxu0 }
 0x582   :  { %v1127_v22 = vpop.f32.mrb[13].mxu0 }
 0x585   :  { %v870_v23 = vpop.f32.mrb[14].mxu0 }
 0x586   :  { %v1130_v24 = vpop.f32.mrb[15].mxu0 }
 0x589   :  { %v875_v25 = vpop.f32.mrb[16].mxu0 }
 0x58a   :  { %v1172_v26 = vpack.c.bf16 %v875_v25, %v870_v23  ;;  %v1133_v17 = vpop.f32.mrb[17].mxu0 }
 0x58c   :  { %1174 = vmatpush3.bf16.xpose.msk.msra.mxu1 %vm1173_vm12, %v1172_v26 }
 0x593   :  { %1139 = vmatmul.mubr.msk.f32.vlgmr.msra.gmra.mrb[12].mxu1 %vm879_vm11, %v865_v21 }
 0x666   :  { %v955_v27 = vpop.f32.mrb[12].mxu1 }
 0x667   :  { %959 = vst.msk [vmem:[#allocation3] sm:$0xff] %vm368_vm5, %v955_v27  ;;  %v1140_v28 = vpop.f32.mrb[13].mxu1 }
 0x668   :  { %1211 = shalt.err (!%p1208_p4)
}
 0x669   :  { %s1212_s27 = scalar_lea.hbm %s1495_s11, 128 }
 0x66a   :  { %p1213_p5 = scmp.ne.s32.totalorder %s1495_s11, %s1212_s27  ;;  %p1216_p6 = scmp.lt.u32.totalorder %s1212_s27, %s1495_s11 }
 0x66c   :  { %p1218_p7 = pnand %p1216_p6, %p1213_p5 }
 0x66e   :  { %1221 = shalt.err (!%p1218_p7)
}
 0x66f   :  { %969 = dma.vmem_to_hbm [thread:$0]  %s967_s1, 128, %s1495_s11, [#allocation4]  }
 0x670   :  { %1222 = dma.done.wait [#allocation4], 128  }
 0x671   :  { %1223 = vsyncadd [#allocation4], 4294967168 }
 0x672   :  { %973 = vsyncpa [#allocation4], 1 }

</bundles_post_ra>
